<compile_context>
chip_gen: v5e
topology: v5e:2x2
jax: 0.10.0
libtpu: 0.0.40
codegen_flags: <defaults>
</compile_context>

<pallas_src>
import math
import numpy as np
import jax
import jax.numpy as jnp
from jax import lax
from jax.experimental import pallas as pl
from jax.experimental.pallas import tpu as pltpu

_EPS = 1e-4      # matches F.cosine_similarity(..., eps=0.0001)
_LANES = 128


def _round_up(x, m):
    return (x + m - 1) // m * m


def _make_kernel(apply_linear, tile_b, feat, batch):
    """feat = padded feature width the cosine reduction runs over
       (padded out_dim when the Linear is applied, padded D otherwise)."""
    groups = feat // _LANES
    inv_batch = 1.0 / batch
    dn = (((1,), (1,)), ((), ()))          # contract last dims (A @ B^T)

    def _fold_prod(a, b):
        # sum over 128-lane groups of a*b  -> (tile_b, 128) f32
        acc = a[:, :_LANES].astype(jnp.float32) * b[:, :_LANES].astype(jnp.float32)
        for g in range(1, groups):
            sl = slice(g * _LANES, (g + 1) * _LANES)
            acc = acc + a[:, sl].astype(jnp.float32) * b[:, sl].astype(jnp.float32)
        return acc

    def _cosine_and_loss(h1, h2, label_ref, loss_ref, score_ref, acc_ref):
        i = pl.program_id(0)

        @pl.when(i == 0)
        def _():
            acc_ref[...] = jnp.zeros_like(acc_ref)

        ones_row = jnp.ones((1, _LANES), jnp.float32)
        # ones @ P^T puts each per-row reduction directly in lane-dense
        # (1, tile_b) layout (batch mapped to lanes) -- no relayout needed.
        num = lax.dot_general(ones_row, _fold_prod(h1, h2), dn,
                              preferred_element_type=jnp.float32)
        n1sq = lax.dot_general(ones_row, _fold_prod(h1, h1), dn,
                               preferred_element_type=jnp.float32)
        n2sq = lax.dot_general(ones_row, _fold_prod(h2, h2), dn,
                               preferred_element_type=jnp.float32)

        # Modern torch F.cosine_similarity clamps (||x1||*||x2||)^2 at eps^2.
        # (Older versions clamp each norm separately; only differs for
        # near-zero vectors.)
        denom_sq = jnp.maximum(n1sq * n2sq, _EPS * _EPS)
        score = num * lax.rsqrt(denom_sq)               # (1, tile_b), EUP rsqrt
        score_ref[...] = score

        # masked MSE partial sum over the valid rows of this tile
        col = lax.broadcasted_iota(jnp.int32, (1, tile_b), 1) + i * tile_b
        diff = jnp.where(col < batch, score - label_ref[...], 0.0)
        acc_ref[...] += jnp.sum(diff * diff, keepdims=True)
        loss_ref[...] = acc_ref[...] * inv_batch        # last grid step wins

    if apply_linear:
        def kernel(emb1_ref, emb2_ref, w_ref, b_ref, label_ref,
                   loss_ref, score_ref, acc_ref):
            # one fused MXU matmul for both embeddings (single weight push),
            # contraction on dim 1 of both operands == x @ W^T (no transpose).
            x = jnp.concatenate([emb1_ref[...], emb2_ref[...]], axis=0)
            h = lax.dot_general(x, w_ref[...], dn,
                                preferred_element_type=jnp.float32)
            h = h + b_ref[...]
            _cosine_and_loss(h[:tile_b], h[tile_b:], label_ref,
                             loss_ref, score_ref, acc_ref)
    else:
        def kernel(emb1_ref, emb2_ref, label_ref, loss_ref, score_ref, acc_ref):
            _cosine_and_loss(emb1_ref[...], emb2_ref[...], label_ref,
                             loss_ref, score_ref, acc_ref)

    return kernel


def cosine_distance_loss_pallas(emb1, emb2, true_label, weight=None, bias=None,
                                reduce_cls_vec=True):
    """emb1, emb2: (B, word_vec_dim); true_label: (B,);
       weight: (out_dim, word_vec_dim); bias: (out_dim,).
       Returns (loss scalar f32, score (B,) f32)."""
    B, D = emb1.shape
    d_pad = _round_up(D, _LANES)

    # Batch tile: multiple of 128 lanes, budgeted so 2 bf16 inputs x 2 pipeline
    # buffers stay under ~16 MiB (fits v5e/v6e and v7x's smaller VMEM).
    tb = 512
    while tb > _LANES and 8 * tb * d_pad > 16 * 1024 * 1024:
        tb //= 2
    tb = min(tb, _round_up(B, _LANES))
    b_pad = _round_up(B, tb)
    n_tiles = b_pad // tb

    to_bf16 = lambda a: jnp.asarray(a, jnp.bfloat16)
    e1 = jnp.pad(to_bf16(emb1), ((0, b_pad - B), (0, d_pad - D)))
    e2 = jnp.pad(to_bf16(emb2), ((0, b_pad - B), (0, d_pad - D)))
    lbl = jnp.pad(jnp.asarray(true_label, jnp.float32).reshape(1, B),
                  ((0, 0), (0, b_pad - B)))

    emb_spec = pl.BlockSpec((tb, d_pad), lambda i: (i, 0))
    row_spec = pl.BlockSpec((1, tb), lambda i: (0, i))       # lane-dense batch
    out_shape = (jax.ShapeDtypeStruct((1, 1), jnp.float32),      # loss
                 jax.ShapeDtypeStruct((1, b_pad), jnp.float32))  # score (lane-dense)
    out_specs = (pl.BlockSpec((1, 1), lambda i: (0, 0)), row_spec)
    scratch = [pltpu.VMEM((1, 1), jnp.float32)]                  # sum((score-y)^2)
    # Batch axis carries the MSE accumulator -> "arbitrary" (serial).
    # TODO(synk): per-core partial loss sums would let v7x's 2 TensorCores split the grid.
    cparams = pltpu.CompilerParams(dimension_semantics=("arbitrary",))

    if reduce_cls_vec:
        out_dim = weight.shape[0]
        out_pad = _round_up(out_dim, _LANES)
        # weight stays (out_dim, D) -- contracted as x @ W^T inside the kernel
        w = jnp.pad(to_bf16(weight), ((0, out_pad - out_dim), (0, d_pad - D)))
        bvec = jnp.pad(jnp.asarray(bias, jnp.float32).reshape(1, out_dim),
                       ((0, 0), (0, out_pad - out_dim)))
        loss, score = pl.pallas_call(
            _make_kernel(True, tb, out_pad, B),
            out_shape=out_shape,
            grid_spec=pltpu.PrefetchScalarGridSpec(
                num_scalar_prefetch=0,
                grid=(n_tiles,),
                in_specs=[emb_spec, emb_spec,
                          pl.BlockSpec((out_pad, d_pad), lambda i: (0, 0)),
                          pl.BlockSpec((1, out_pad), lambda i: (0, 0)),
                          row_spec],
                out_specs=out_specs,
                scratch_shapes=scratch),
            compiler_params=cparams,
        )(e1, e2, w, bvec, lbl)
    else:
        # No Linear: separate pallas_call that never DMAs weight/bias.
        loss, score = pl.pallas_call(
            _make_kernel(False, tb, d_pad, B),
            out_shape=out_shape,
            grid_spec=pltpu.PrefetchScalarGridSpec(
                num_scalar_prefetch=0,
                grid=(n_tiles,),
                in_specs=[emb_spec, emb_spec, row_spec],
                out_specs=out_specs,
                scratch_shapes=scratch),
            compiler_params=cparams,
        )(e1, e2, lbl)

    return loss[0, 0], score[0, :B]


def _init_params(key, word_vec_dim, out_dim):
    """nn.Linear + xavier_uniform_ on the weight (deterministic JAX init)."""
    k_w, k_b = jax.random.split(key)
    a = math.sqrt(6.0 / (word_vec_dim + out_dim))          # xavier_uniform_
    weight = jax.random.uniform(k_w, (out_dim, word_vec_dim),
                                minval=-a, maxval=a, dtype=jnp.float32)
    bb = 1.0 / math.sqrt(word_vec_dim)                     # default bias init
    bias = jax.random.uniform(k_b, (out_dim,),
                              minval=-bb, maxval=bb, dtype=jnp.float32)
    return weight, bias


def _reference(emb1, emb2, true_label, weight=None, bias=None,
               reduce_cls_vec=True):
    if reduce_cls_vec:
        emb1 = emb1 @ weight.T + bias
        emb2 = emb2 @ weight.T + bias
    num = jnp.sum(emb1 * emb2, axis=1)
    n1sq = jnp.sum(emb1 * emb1, axis=1)
    n2sq = jnp.sum(emb2 * emb2, axis=1)
    score = num / jnp.sqrt(jnp.maximum(n1sq * n2sq, _EPS * _EPS))
    loss = jnp.mean((score - true_label) ** 2)
    return loss, score


def _bf16(x):
    return jnp.asarray(x, jnp.bfloat16).astype(jnp.float32)


if __name__ == "__main__":
    B, word_vec_dim, out_dim = 8, 32, 16

    key = jax.random.PRNGKey(0)
    k1, k2, k3, k4 = jax.random.split(key, 4)

    emb1 = jax.random.normal(k1, (B, word_vec_dim), dtype=jnp.float32)
    emb2 = jax.random.normal(k2, (B, word_vec_dim), dtype=jnp.float32)
    true_label = jax.random.uniform(k3, (B,), minval=-1.0, maxval=1.0,
                                    dtype=jnp.float32)
    weight, bias = _init_params(k4, word_vec_dim, out_dim)

    # reduce_cls_vec=True path (Linear + cosine + MSE)
    loss, score = cosine_distance_loss_pallas(
        emb1, emb2, true_label, weight, bias, reduce_cls_vec=True)
    jax.block_until_ready((loss, score))

    # strict check vs a reference computed on the same bf16-rounded inputs
    ref_loss, ref_score = _reference(_bf16(emb1), _bf16(emb2), true_label,
                                     _bf16(weight), bias, True)
    np.testing.assert_allclose(np.asarray(score), np.asarray(ref_score),
                               rtol=5e-3, atol=5e-3)
    np.testing.assert_allclose(np.asarray(loss), np.asarray(ref_loss),
                               rtol=5e-3, atol=5e-3)
    # loose check vs full-f32 module semantics (bf16 streaming noise only)
    f_loss, f_score = _reference(emb1, emb2, true_label, weight, bias, True)
    np.testing.assert_allclose(np.asarray(score), np.asarray(f_score),
                               rtol=5e-2, atol=5e-2)
    np.testing.assert_allclose(np.asarray(loss), np.asarray(f_loss),
                               rtol=5e-2, atol=5e-2)

    # reduce_cls_vec=False path (no Linear, no weight/bias DMA)
    loss2, score2 = cosine_distance_loss_pallas(
        emb1, emb2, true_label, reduce_cls_vec=False)
    jax.block_until_ready((loss2, score2))
    ref_loss2, ref_score2 = _reference(_bf16(emb1), _bf16(emb2), true_label,
                                       reduce_cls_vec=False)
    np.testing.assert_allclose(np.asarray(score2), np.asarray(ref_score2),
                               rtol=5e-3, atol=5e-3)
    np.testing.assert_allclose(np.asarray(loss2), np.asarray(ref_loss2),
                               rtol=5e-3, atol=5e-3)

    print("KERNEL_OK")
</pallas_src>

<mosaic_0001>
module attributes {stable_mosaic.version = 11 : i64} {
  func.func @kernel(%arg0: i32, %arg1: memref<128x128xbf16, #tpu.memory_space<vmem>>, %arg2: memref<128x128xbf16, #tpu.memory_space<vmem>>, %arg3: memref<128x128xbf16, #tpu.memory_space<vmem>>, %arg4: memref<1x128xf32, #tpu.memory_space<vmem>>, %arg5: memref<1x128xf32, #tpu.memory_space<vmem>>, %arg6: memref<1x1xf32, #tpu.memory_space<vmem>>, %arg7: memref<1x128xf32, #tpu.memory_space<vmem>>, %arg8: memref<1x1xf32, #tpu.memory_space<vmem>>) attributes {dimension_semantics = [#tpu.dimension_semantics<arbitrary>], iteration_bounds = array<i64: 1>, scalar_prefetch = 0 : i64, scratch_operands = 1 : i64, tpu.core_type = #tpu.core_type<tc>, window_params = [{transform_indices = @transform_0, window_bounds = array<i64: 128, 128>}, {transform_indices = @transform_1, window_bounds = array<i64: 128, 128>}, {pipeline_mode = #tpu.pipeline_mode<synchronous>, transform_indices = @transform_2, window_bounds = array<i64: 128, 128>}, {pipeline_mode = #tpu.pipeline_mode<synchronous>, transform_indices = @transform_3, window_bounds = array<i64: 1, 128>}, {transform_indices = @transform_4, window_bounds = array<i64: 1, 128>}, {pipeline_mode = #tpu.pipeline_mode<synchronous>, transform_indices = @transform_5, window_bounds = array<i64: 1, 1>}, {transform_indices = @transform_6, window_bounds = array<i64: 1, 128>}]} {
    %c0 = arith.constant 0 : index
    %c0_0 = arith.constant 0 : index
    %0 = vector.load %arg1[%c0, %c0_0] : memref<128x128xbf16, #tpu.memory_space<vmem>>, vector<128x128xbf16>
    %c0_1 = arith.constant 0 : index
    %c0_2 = arith.constant 0 : index
    %1 = vector.load %arg2[%c0_1, %c0_2] : memref<128x128xbf16, #tpu.memory_space<vmem>>, vector<128x128xbf16>
    %2 = tpu.concatenate %0, %1 in 0 : vector<128x128xbf16>, vector<128x128xbf16> -> vector<256x128xbf16>
    %c0_3 = arith.constant 0 : index
    %c0_4 = arith.constant 0 : index
    %3 = vector.load %arg3[%c0_3, %c0_4] : memref<128x128xbf16, #tpu.memory_space<vmem>>, vector<128x128xbf16>
    %cst = arith.constant dense<0.000000e+00> : vector<256x128xf32>
    %4 = tpu.matmul %2, %3, %cst {dimension_numbers = #tpu.dot_dimension_numbers<[1], [1], [0], [0], [0, 0, 1, 0], [], []>} : vector<256x128xbf16>, vector<128x128xbf16>, vector<256x128xf32> -> vector<256x128xf32>
    %c0_5 = arith.constant 0 : index
    %c0_6 = arith.constant 0 : index
    %5 = vector.load %arg4[%c0_5, %c0_6] : memref<1x128xf32, #tpu.memory_space<vmem>>, vector<1x128xf32>
    %6 = vector.broadcast %5 : vector<1x128xf32> to vector<256x128xf32>
    %7 = arith.addf %4, %6 : vector<256x128xf32>
    %8 = vector.extract_strided_slice %7 {offsets = [0, 0], sizes = [128, 128], strides = [1, 1]} : vector<256x128xf32> to vector<128x128xf32>
    %9 = vector.extract_strided_slice %7 {offsets = [128, 0], sizes = [128, 128], strides = [1, 1]} : vector<256x128xf32> to vector<128x128xf32>
    %c0_i32 = arith.constant 0 : i32
    %10 = arith.cmpi eq, %arg0, %c0_i32 : i32
    %11 = arith.extui %10 : i1 to i32
    %c0_i32_7 = arith.constant 0 : i32
    %12 = arith.cmpi ne, %11, %c0_i32_7 : i32
    scf.if %12 {
      %cst_28 = arith.constant 0.000000e+00 : f32
      %49 = vector.broadcast %cst_28 : f32 to vector<1x1xf32>
      %c0_29 = arith.constant 0 : index
      %c0_30 = arith.constant 0 : index
      %50 = vector.load %arg8[%c0_29, %c0_30] : memref<1x1xf32, #tpu.memory_space<vmem>>, vector<1x1xf32>
      tpu.vector_store %arg8[%c0_29, %c0_30], %49 {strides = array<i32>} : memref<1x1xf32, #tpu.memory_space<vmem>>, vector<1x1xf32>,
    } else {
    }
    %cst_8 = arith.constant 1.000000e+00 : f32
    %13 = vector.broadcast %cst_8 : f32 to vector<1x128xf32>
    %14 = arith.mulf %8, %9 : vector<128x128xf32>
    %cst_9 = arith.constant dense<0.000000e+00> : vector<1x128xf32>
    %15 = tpu.matmul %13, %14, %cst_9 {dimension_numbers = #tpu.dot_dimension_numbers<[1], [1], [0], [0], [0, 0, 1, 0], [], []>} : vector<1x128xf32>, vector<128x128xf32>, vector<1x128xf32> -> vector<1x128xf32>
    %16 = arith.mulf %8, %8 : vector<128x128xf32>
    %cst_10 = arith.constant dense<0.000000e+00> : vector<1x128xf32>
    %17 = tpu.matmul %13, %16, %cst_10 {dimension_numbers = #tpu.dot_dimension_numbers<[1], [1], [0], [0], [0, 0, 1, 0], [], []>} : vector<1x128xf32>, vector<128x128xf32>, vector<1x128xf32> -> vector<1x128xf32>
    %18 = arith.mulf %9, %9 : vector<128x128xf32>
    %cst_11 = arith.constant dense<0.000000e+00> : vector<1x128xf32>
    %19 = tpu.matmul %13, %18, %cst_11 {dimension_numbers = #tpu.dot_dimension_numbers<[1], [1], [0], [0], [0, 0, 1, 0], [], []>} : vector<1x128xf32>, vector<128x128xf32>, vector<1x128xf32> -> vector<1x128xf32>
    %20 = arith.mulf %17, %19 : vector<1x128xf32>
    %cst_12 = arith.constant 9.99999993E-9 : f32
    %21 = vector.broadcast %cst_12 : f32 to vector<1x128xf32>
    %22 = arith.maximumf %20, %21 : vector<1x128xf32>
    %23 = math.rsqrt %22 : vector<1x128xf32>
    %24 = arith.mulf %15, %23 : vector<1x128xf32>
    %c0_13 = arith.constant 0 : index
    %c0_14 = arith.constant 0 : index
    %25 = vector.load %arg7[%c0_13, %c0_14] : memref<1x128xf32, #tpu.memory_space<vmem>>, vector<1x128xf32>
    tpu.vector_store %arg7[%c0_13, %c0_14], %24 {strides = array<i32>} : memref<1x128xf32, #tpu.memory_space<vmem>>, vector<1x128xf32>,
    %26 = tpu.iota {dimensions = array<i32: 1>} : vector<1x128xi32>
    %c128_i32 = arith.constant 128 : i32
    %27 = arith.muli %arg0, %c128_i32 : i32
    %28 = vector.broadcast %27 : i32 to vector<1x128xi32>
    %29 = arith.addi %26, %28 : vector<1x128xi32>
    %c8_i32 = arith.constant 8 : i32
    %30 = vector.broadcast %c8_i32 : i32 to vector<1x128xi32>
    %31 = arith.cmpi slt, %29, %30 : vector<1x128xi32>
    %c0_15 = arith.constant 0 : index
    %c0_16 = arith.constant 0 : index
    %32 = vector.load %arg5[%c0_15, %c0_16] : memref<1x128xf32, #tpu.memory_space<vmem>>, vector<1x128xf32>
    %33 = arith.subf %24, %32 : vector<1x128xf32>
    %cst_17 = arith.constant 0.000000e+00 : f32
    %34 = vector.broadcast %cst_17 : f32 to vector<1x128xf32>
    %35 = arith.select %31, %33, %34 : vector<1x128xi1>, vector<1x128xf32>
    %c0_18 = arith.constant 0 : index
    %c0_19 = arith.constant 0 : index
    %36 = vector.load %arg8[%c0_18, %c0_19] : memref<1x1xf32, #tpu.memory_space<vmem>>, vector<1x1xf32>
    %37 = arith.mulf %35, %35 : vector<1x128xf32>
    %38 = vector.shape_cast %37 : vector<1x128xf32> to vector<1x1x128xf32>
    %cst_20 = arith.constant dense<0.000000e+00> : vector<1xf32>
    %39 = vector.multi_reduction <add>, %38, %cst_20 [1, 2] : vector<1x1x128xf32> to vector<1xf32>
    %40 = vector.shape_cast %39 : vector<1xf32> to vector<1x1x1xf32>
    %41 = vector.extract %40[0, 0, 0] : f32 from vector<1x1x1xf32>
    %42 = vector.broadcast %41 : f32 to vector<1x1xf32>
    %43 = arith.addf %36, %42 : vector<1x1xf32>
    %c0_21 = arith.constant 0 : index
    %c0_22 = arith.constant 0 : index
    %44 = vector.load %arg8[%c0_21, %c0_22] : memref<1x1xf32, #tpu.memory_space<vmem>>, vector<1x1xf32>
    tpu.vector_store %arg8[%c0_21, %c0_22], %43 {strides = array<i32>} : memref<1x1xf32, #tpu.memory_space<vmem>>, vector<1x1xf32>,
    %c0_23 = arith.constant 0 : index
    %c0_24 = arith.constant 0 : index
    %45 = vector.load %arg8[%c0_23, %c0_24] : memref<1x1xf32, #tpu.memory_space<vmem>>, vector<1x1xf32>
    %cst_25 = arith.constant 1.250000e-01 : f32
    %46 = vector.broadcast %cst_25 : f32 to vector<1x1xf32>
    %47 = arith.mulf %45, %46 : vector<1x1xf32>
    %c0_26 = arith.constant 0 : index
    %c0_27 = arith.constant 0 : index
    %48 = vector.load %arg6[%c0_26, %c0_27] : memref<1x1xf32, #tpu.memory_space<vmem>>, vector<1x1xf32>
    tpu.vector_store %arg6[%c0_26, %c0_27], %47 {strides = array<i32>} : memref<1x1xf32, #tpu.memory_space<vmem>>, vector<1x1xf32>,
    return
  }
  func.func @transform_0(%arg0: i32) -> (i32, i32) {
    %c0_i32 = arith.constant 0 : i32
    %c0_i32_0 = arith.constant 0 : i32
    return %arg0, %c0_i32 : i32, i32
  }
  func.func @transform_1(%arg0: i32) -> (i32, i32) {
    %c0_i32 = arith.constant 0 : i32
    %c0_i32_0 = arith.constant 0 : i32
    return %arg0, %c0_i32 : i32, i32
  }
  func.func @transform_2(%arg0: i32) -> (i32, i32) {
    %c0_i32 = arith.constant 0 : i32
    %c0_i32_0 = arith.constant 0 : i32
    %c0_i32_1 = arith.constant 0 : i32
    return %c0_i32, %c0_i32_0 : i32, i32
  }
  func.func @transform_3(%arg0: i32) -> (i32, i32) {
    %c0_i32 = arith.constant 0 : i32
    %c0_i32_0 = arith.constant 0 : i32
    %c0_i32_1 = arith.constant 0 : i32
    return %c0_i32, %c0_i32_0 : i32, i32
  }
  func.func @transform_4(%arg0: i32) -> (i32, i32) {
    %c0_i32 = arith.constant 0 : i32
    %c0_i32_0 = arith.constant 0 : i32
    return %c0_i32, %arg0 : i32, i32
  }
  func.func @transform_5(%arg0: i32) -> (i32, i32) {
    %c0_i32 = arith.constant 0 : i32
    %c0_i32_0 = arith.constant 0 : i32
    %c0_i32_1 = arith.constant 0 : i32
    return %c0_i32, %c0_i32_0 : i32, i32
  }
  func.func @transform_6(%arg0: i32) -> (i32, i32) {
    %c0_i32 = arith.constant 0 : i32
    %c0_i32_0 = arith.constant 0 : i32
    return %c0_i32, %arg0 : i32, i32
  }
}

</mosaic_0001>

<bundles_post_ra>
// kernel: tpu_custom_call.1
= control target key start
LH: loop header
LB: loop body
LE: loop exit
PB: predicated region body
PF: predicated region fallthrough
CT: control target
= control target key end

     0   :  { %12 = vsyncpa [#allocation4], 0  ;;  %s988_s0 = inlined_call_operand.hbm [shape: bf16[128,128], index: 0, kind: input, shape index: {}]   ;;  %s989_s1 = inlined_call_operand.hbm [shape: bf16[128,128], index: 1, kind: input, shape index: {}]   ;;  %s990_s2 = inlined_call_operand.hbm [shape: bf16[128,128], index: 2, kind: input, shape index: {}]   ;;  %s991_s3 = inlined_call_operand.vmem [shape: f32[1,128], index: 3, kind: input, shape index: {}]   ;;  %s992_s4 = inlined_call_operand.vmem [shape: f32[1,128], index: 4, kind: input, shape index: {}]   ;;  %s993_s5 = inlined_call_operand.hbm [shape: f32[1,1], index: 5, kind: output, shape index: {0}]   ;;  %s994_s6 = inlined_call_operand.hbm [shape: f32[1,128], index: 6, kind: output, shape index: {1}]  }
   0x1   :  { %13 = vsyncpa [#allocation7], 0 }
   0x2   :  { %14 = vsyncpa [#allocation5], 0 }
   0x3   :  { %15 = vsyncpa [#allocation11], 0  ;;  %s33_s23 = sshll.u32 %s989_s1, 4  ;;  %s833_s24 = smov [#allocation6]   ;;  %s34_s23 = int_to_ptr.hbm [resolvable:$true] %s33_s23 }
   0x4   :  { %s35_s25 = sshll.u32 %s833_s24, 4  ;;  %s20_s28 = sshll.u32 %s988_s0, 4  ;;  %s36_s25 = int_to_ptr.vmem [resolvable:$true] %s35_s25  ;;  %s21_s28 = int_to_ptr.hbm [resolvable:$true] %s20_s28 }
   0x5   :  { %s834_s29 = smov 64   ;;  %s835_s30 = smov 4  }
   0x6   :  { %41 = dma.hbm_to_vmem [thread:$0]  %s34_s23, 1024, %s36_s25, [#allocation7], %s834_s29, %s834_s29, %s835_s30  }
   0x7   :  { %s836_s7 = smov [#allocation3]   ;;  %s46_s11 = sshll.u32 %s990_s2, 4  ;;  %s47_s11 = int_to_ptr.hbm [resolvable:$true] %s46_s11 }
   0x8   :  { %s22_s8 = sshll.u32 %s836_s7, 4  ;;  %s837_s1 = smov [#allocation8]   ;;  %s23_s8 = int_to_ptr.vmem [resolvable:$true] %s22_s8 }
   0x9   :  { %28 = dma.hbm_to_vmem [thread:$0]  %s21_s28, 1024, %s23_s8, [#allocation4], %s834_s29, %s834_s29, %s835_s30  }
   0xa   :  { %s48_s12 = sshll.u32 %s837_s1, 4  ;;  %s49_s12 = int_to_ptr.vmem [resolvable:$true] %s48_s12 }
   0xb   :  { %54 = dma.hbm_to_vmem [thread:$0]  %s47_s11, 1024, %s49_s12, [#allocation7], %s834_s29, %s834_s29, %s835_s30  }
   0xc   :  { %825 = dma.done.wait [#allocation4], 1024  }
   0xd   :  { %826 = vsyncadd [#allocation4], 4294966272 }
   0xe   :  { %827 = dma.done.wait [#allocation7], 2048  }
   0xf   :  { %828 = vsyncadd [#allocation7], 4294965248  ;;  %v666_v0 = vld [vmem:[#allocation8 + $0x38] sm:$0xff]  ;;  %v665_v1 = vld [vmem:[#allocation8 + $0x30] sm:$0xff]  ;;  %vm495_vm4 = vcmask 1040384   ;;  %s839_s14 = smov [#allocation10]  }
  0x10   :  { %267 = vmatpush.bf16.xpose.msra.mxu0 %v666_v0  ;;  %667 = vmatpush.bf16.xpose.msra.mxu1 %v666_v0  ;;  %v664_v2 = vld [vmem:[#allocation8 + $0x28] sm:$0xff]  ;;  %v663_v3 = vld [vmem:[#allocation8 + $0x20] sm:$0xff]  ;;  %v662_v4 = vld [vmem:[#allocation8 + $0x18] sm:$0xff]  ;;  %s529_s15 = sshll.u32 %s839_s14, 4  ;;  %s531_s18 = sshll.u32 %s994_s6, 4  ;;  %vm360_vm5 = vcmask 0   ;;  %s530_s15 = int_to_ptr.vmem [resolvable:$true] %s529_s15  ;;  %s532_s18 = int_to_ptr.hbm [resolvable:$true] %s531_s18 }
  0x11   :  { %669 = vmatpush.bf16.xpose.msra.mxu3 %v666_v0  ;;  %668 = vmatpush.bf16.xpose.msra.mxu2 %v666_v0  ;;  %v661_v5 = vld [vmem:[#allocation8 + $0x10] sm:$0xff]  ;;  %v660_v6 = vld [vmem:[#allocation8 + $0x8] sm:$0xff]  ;;  %v659_v7 = vld [vmem:[#allocation8] sm:$0xff]  ;;  %s841_s6 = smov [#allocation9]   ;;  %s520_s22 = sshll.u32 %s993_s5, 4  ;;  %s521_s22 = int_to_ptr.hbm [resolvable:$true] %s520_s22 }
  0x12   :  { %v643_v8 = vld [vmem:[#allocation3] sm:$0xff]  ;;  %v648_v9 = vld [vmem:[#allocation3 + $0x28] sm:$0xff]  ;;  %v649_v13 = vld [vmem:[#allocation3 + $0x30] sm:$0xff]  ;;  %s518_s19 = sshll.u32 %s841_s6, 4  ;;  %s519_s19 = int_to_ptr.vmem [resolvable:$true] %s518_s19 }
  0x13   :  { %v656_v10 = vld [vmem:[#allocation6 + $0x28] sm:$0xff]  ;;  %v657_v14 = vld [vmem:[#allocation6 + $0x30] sm:$0xff]  ;;  %v650_v17 = vld [vmem:[#allocation3 + $0x38] sm:$0xff] }
  0x14   :  { %v652_v11 = vld [vmem:[#allocation6 + $0x8] sm:$0xff]  ;;  %v653_v15 = vld [vmem:[#allocation6 + $0x10] sm:$0xff]  ;;  %v658_v18 = vld [vmem:[#allocation6 + $0x38] sm:$0xff] }
  0x15   :  { %v644_v12 = vld [vmem:[#allocation3 + $0x8] sm:$0xff]  ;;  %v645_v16 = vld [vmem:[#allocation3 + $0x10] sm:$0xff]  ;;  %v654_v19 = vld [vmem:[#allocation6 + $0x18] sm:$0xff] }
  0x16   :  { %v646_v20 = vld [vmem:[#allocation3 + $0x18] sm:$0xff]  ;;  %v651_v21 = vld [vmem:[#allocation6] sm:$0xff] }
  0x17   :  { %v655_v22 = vld [vmem:[#allocation6 + $0x20] sm:$0xff]  ;;  %v895_v30 = vld [vmem:[%s991_s3] ss:$0 sm:$0xff] }
  0x18   :  { %268 = vmatpush.bf16.xpose.msra.mxu0 %v665_v1  ;;  %670 = vmatpush.bf16.xpose.msra.mxu1 %v665_v1  ;;  %v647_v23 = vld [vmem:[#allocation3 + $0x20] sm:$0xff] }
  0x19   :  { %672 = vmatpush.bf16.xpose.msra.mxu3 %v665_v1  ;;  %671 = vmatpush.bf16.xpose.msra.mxu2 %v665_v1 }
  0x20   :  { %269 = vmatpush.bf16.xpose.msra.mxu0 %v664_v2  ;;  %673 = vmatpush.bf16.xpose.msra.mxu1 %v664_v2 }
  0x21   :  { %675 = vmatpush.bf16.xpose.msra.mxu3 %v664_v2  ;;  %674 = vmatpush.bf16.xpose.msra.mxu2 %v664_v2 }
  0x28   :  { %270 = vmatpush.bf16.xpose.msra.mxu0 %v663_v3  ;;  %676 = vmatpush.bf16.xpose.msra.mxu1 %v663_v3 }
  0x29   :  { %678 = vmatpush.bf16.xpose.msra.mxu3 %v663_v3  ;;  %677 = vmatpush.bf16.xpose.msra.mxu2 %v663_v3 }
  0x30   :  { %271 = vmatpush.bf16.xpose.msra.mxu0 %v662_v4  ;;  %679 = vmatpush.bf16.xpose.msra.mxu1 %v662_v4 }
  0x31   :  { %681 = vmatpush.bf16.xpose.msra.mxu3 %v662_v4  ;;  %680 = vmatpush.bf16.xpose.msra.mxu2 %v662_v4 }
  0x38   :  { %272 = vmatpush.bf16.xpose.msra.mxu0 %v661_v5  ;;  %682 = vmatpush.bf16.xpose.msra.mxu1 %v661_v5 }
  0x39   :  { %684 = vmatpush.bf16.xpose.msra.mxu3 %v661_v5  ;;  %683 = vmatpush.bf16.xpose.msra.mxu2 %v661_v5 }
  0x40   :  { %273 = vmatpush.bf16.xpose.msra.mxu0 %v660_v6  ;;  %685 = vmatpush.bf16.xpose.msra.mxu1 %v660_v6 }
  0x41   :  { %687 = vmatpush.bf16.xpose.msra.mxu3 %v660_v6  ;;  %686 = vmatpush.bf16.xpose.msra.mxu2 %v660_v6 }
  0x48   :  { %274 = vmatpush.bf16.xpose.msra.mxu0 %v659_v7  ;;  %688 = vmatpush.bf16.xpose.msra.mxu1 %v659_v7 }
  0x49   :  { %690 = vmatpush.bf16.xpose.msra.mxu3 %v659_v7  ;;  %689 = vmatpush.bf16.xpose.msra.mxu2 %v659_v7 }
  0x4f   :  { %275 = vmatmul.bf16.vlgmr.msra.gmra.mxu0 %v643_v8  ;;  %300 = vmatmul.bf16.vlgmr.msra.gmra.mxu1 %v648_v9 }
  0x50   :  { %340 = vmatmul.bf16.vlgmr.msra.gmra.mxu3 %v656_v10  ;;  %320 = vmatmul.bf16.vlgmr.msra.gmra.mxu2 %v652_v11 }
  0x5f   :  { %280 = vmatmul.bf16.gmra.mxu0 %v644_v12  ;;  %305 = vmatmul.bf16.gmra.mxu1 %v649_v13 }
  0x60   :  { %345 = vmatmul.bf16.gmra.mxu3 %v657_v14  ;;  %325 = vmatmul.bf16.gmra.mxu2 %v653_v15 }
  0x6f   :  { %285 = vmatmul.bf16.gmra.mxu0 %v645_v16  ;;  %310 = vmatmul.bf16.gmra.mxu1 %v650_v17 }
  0x70   :  { %350 = vmatmul.bf16.gmra.mxu3 %v658_v18  ;;  %330 = vmatmul.bf16.gmra.mxu2 %v654_v19 }
  0x7f   :  { %290 = vmatmul.bf16.gmra.mxu0 %v646_v20  ;;  %315 = vmatmul.bf16.gmra.mxu1 %v651_v21 }
  0x80   :  { %335 = vmatmul.bf16.gmra.mxu2 %v655_v22 }
  0x8f   :  { %295 = vmatmul.bf16.gmra.mxu0 %v647_v23 }
  0xcc   :  { %v886_v24 = vpop.f32.mrf.mxu0  ;;  %v301_v25 = vpop.f32.mrf.mxu1 }
  0xcd   :  { %v302_v13 = vadd.f32 %v895_v30, %v301_v25 }
  0xcf   :  { %v408_v18 = vmul.f32 %v302_v13, %v302_v13 }
  0xd3   :  { %v888_v26 = vpop.f32.mrf.mxu3  ;;  %v321_v27 = vpop.f32.mrf.mxu2 }
  0xd4   :  { %v890_v28 = vpop.f32.mrf.mxu0  ;;  %v303_v29 = vpop.f32.mrf.mxu1  ;;  %v898_v31 = vadd.f32 %v895_v30, %v321_v27  ;;  %v342_v20 = vadd.f32 %v895_v30, %v888_v26 }
  0xd5   :  { %v304_v6 = vadd.f32 %v895_v30, %v303_v29 }
  0xd6   :  { %v372_v27 = vmul.f32 %v342_v20, %v302_v13  ;;  %v444_v29 = vmul.f32 %v342_v20, %v342_v20 }
  0xd7   :  { %v409_v14 = vmul.f32 %v304_v6, %v304_v6 }
  0xdb   :  { %v343_v32 = vpop.f32.mrf.mxu3  ;;  %v323_v33 = vpop.f32.mrf.mxu2 }
  0xdc   :  { %v281_v34 = vpop.f32.mrf.mxu0  ;;  %v306_v35 = vpop.f32.mrf.mxu1  ;;  %v910_v42 = vadd.f32 %v895_v30, %v323_v33  ;;  %v344_v15 = vadd.f32 %v895_v30, %v343_v32 }
  0xdd   :  { %v901_v36 = vadd.f32 %v895_v30, %v281_v34  ;;  %v307_v1 = vadd.f32 %v895_v30, %v306_v35 }
  0xde   :  { %v373_v21 = vmul.f32 %v344_v15, %v304_v6  ;;  %v445_v22 = vmul.f32 %v344_v15, %v344_v15 }
  0xdf   :  { %v905_v37 = vmul.f32 %v898_v31, %v901_v36  ;;  %v410_v7 = vmul.f32 %v307_v1, %v307_v1 }
  0xe3   :  { %v346_v38 = vpop.f32.mrf.mxu3  ;;  %v907_v39 = vpop.f32.mrf.mxu2 }
  0xe4   :  { %v283_v40 = vpop.f32.mrf.mxu0  ;;  %v308_v41 = vpop.f32.mrf.mxu1  ;;  %v347_v10 = vadd.f32 %v895_v30, %v346_v38 }
  0xe5   :  { %v913_v43 = vadd.f32 %v895_v30, %v283_v40  ;;  %v309_v56 = vadd.f32 %v895_v30, %v308_v41 }
  0xe6   :  { %v374_v16 = vmul.f32 %v347_v10, %v307_v1  ;;  %v446_v17 = vmul.f32 %v347_v10, %v347_v10 }
  0xe7   :  { %v917_v44 = vmul.f32 %v910_v42, %v913_v43  ;;  %v411_v2 = vmul.f32 %v309_v56, %v309_v56 }
  0xeb   :  { %v348_v45 = vpop.f32.mrf.mxu3  ;;  %v919_v46 = vpop.f32.mrf.mxu2 }
  0xec   :  { %v921_v47 = vpop.f32.mrf.mxu0  ;;  %v311_v48 = vpop.f32.mrf.mxu1  ;;  %v349_v3 = vadd.f32 %v895_v30, %v348_v45 }
  0xed   :  { %v312_v54 = vadd.f32 %v895_v30, %v311_v48  ;;  %v287_v1 = vadd.f32 %v895_v30, %v921_v47  ;;  %v436_v47 = vmul.f32 %v898_v31, %v898_v31 }
  0xee   :  { %v375_v11 = vmul.f32 %v349_v3, %v309_v56  ;;  %v447_v12 = vmul.f32 %v349_v3, %v349_v3 }
  0xef   :  { %v412_v59 = vmul.f32 %v312_v54, %v312_v54 }
  0xf3   :  { %v351_v49 = vpop.f32.mrf.mxu3  ;;  %v923_v50 = vpop.f32.mrf.mxu2 }
  0xf4   :  { %v925_v51 = vpop.f32.mrf.mxu0  ;;  %v313_v52 = vpop.f32.mrf.mxu1  ;;  %v352_v62 = vadd.f32 %v895_v30, %v351_v49 }
  0xf5   :  { %v314_v53 = vadd.f32 %v895_v30, %v313_v52 }
  0xf6   :  { %v376_v4 = vmul.f32 %v352_v62, %v312_v54  ;;  %v448_v5 = vmul.f32 %v352_v62, %v352_v62 }
  0xf7   :  { %v413_v55 = vmul.f32 %v314_v53, %v314_v53 }
  0xf9   :  { %414 = vmatpush.xpose.msrb.mxu2 %v413_v55 }
  0xfb   :  { %v353_v57 = vpop.f32.mrf.mxu3  ;;  %v333_v58 = vpop.f32.mrf.mxu2 }
  0xfc   :  { %v354_v60 = vadd.f32 %v895_v30, %v353_v57  ;;  %v931_v61 = vpop.f32.mrf.mxu0  ;;  %v334_v41 = vadd.f32 %v895_v30, %v333_v58  ;;  %v329_v58 = vadd.f32 %v895_v30, %v919_v46 }
  0xfd   :  { %415 = vmatpush.xpose.msrb.mxu2 %v412_v59  ;;  %v292_v55 = vadd.f32 %v895_v30, %v931_v61  ;;  %v316_v61 = vpop.f32.mrf.mxu1 }
  0xfe   :  { %v377_v63 = vmul.f32 %v354_v60, %v314_v53  ;;  %v449_v0 = vmul.f32 %v354_v60, %v354_v60  ;;  %v332_v53 = vadd.f32 %v895_v30, %v923_v50  ;;  %v441_v54 = vmul.f32 %v334_v41, %v334_v41 }
  0xff   :  { %v289_v60 = vadd.f32 %v895_v30, %v925_v51  ;;  %v327_v50 = vadd.f32 %v895_v30, %v907_v39  ;;  %v401_v39 = vmul.f32 %v913_v43, %v913_v43  ;;  %v277_v43 = vadd.f32 %v895_v30, %v886_v24 }
 0x100   :  { %378 = vmatpush.xpose.msrb.mxu1 %v377_v63  ;;  %450 = vmatpush.xpose.msrb.mxu3 %v449_v0  ;;  %v440_v59 = vmul.f32 %v332_v53, %v332_v53  ;;  %v368_v62 = vmul.f32 %v332_v53, %v292_v55  ;;  %v404_v63 = vmul.f32 %v292_v55, %v292_v55 }
 0x101   :  { %416 = vmatpush.xpose.msrb.mxu2 %v411_v2  ;;  %v439_v0 = vmul.f32 %v329_v58, %v329_v58  ;;  %v367_v2 = vmul.f32 %v329_v58, %v289_v60  ;;  %v403_v3 = vmul.f32 %v289_v60, %v289_v60  ;;  %v438_v46 = vmul.f32 %v327_v50, %v327_v50 }
 0x102   :  { %v366_v51 = vmul.f32 %v327_v50, %v287_v1 }
 0x103   :  { %v336_v9 = vpop.f32.mrf.mxu2 }
 0x104   :  { %379 = vmatpush.xpose.msrb.mxu1 %v376_v4  ;;  %451 = vmatpush.xpose.msrb.mxu3 %v448_v5  ;;  %v293_v8 = vpop.f32.mrf.mxu0  ;;  %v337_v34 = vadd.f32 %v895_v30, %v336_v9  ;;  %v402_v4 = vmul.f32 %v287_v1, %v287_v1  ;;  %v437_v5 = vmul.f32 %v910_v42, %v910_v42 }
 0x105   :  { %417 = vmatpush.xpose.msrb.mxu2 %v410_v7  ;;  %v294_v48 = vadd.f32 %v895_v30, %v293_v8  ;;  %v318_v6 = vpop.f32.mrf.mxu1  ;;  %v279_v7 = vadd.f32 %v895_v30, %v890_v28  ;;  %v400_v9 = vmul.f32 %v901_v36, %v901_v36  ;;  %v838_v36 = vmov 1.0  }
 0x106   :  { %v442_v45 = vmul.f32 %v337_v34, %v337_v34  ;;  %v319_v8 = vadd.f32 %v895_v30, %v318_v6 }
 0x107   :  { %v369_v56 = vmul.f32 %v334_v41, %v294_v48  ;;  %v405_v57 = vmul.f32 %v294_v48, %v294_v48  ;;  %v399_v31 = vmul.f32 %v279_v7, %v279_v7 }
 0x108   :  { %380 = vmatpush.xpose.msrb.mxu1 %v375_v11  ;;  %452 = vmatpush.xpose.msrb.mxu3 %v447_v12  ;;  %v435_v42 = vmul.f32 %v319_v8, %v319_v8  ;;  %v363_v10 = vmul.f32 %v319_v8, %v279_v7  ;;  %v398_v12 = vmul.f32 %v277_v43, %v277_v43 }
 0x109   :  { %418 = vmatpush.xpose.msrb.mxu2 %v409_v14 }
 0x10b   :  { %v338_v23 = vpop.f32.mrf.mxu2 }
 0x10c   :  { %381 = vmatpush.xpose.msrb.mxu1 %v374_v16  ;;  %453 = vmatpush.xpose.msrb.mxu3 %v446_v17  ;;  %v296_v19 = vpop.f32.mrf.mxu0  ;;  %v339_v25 = vadd.f32 %v895_v30, %v338_v23 }
 0x10d   :  { %419 = vmatpush.xpose.msrb.mxu2 %v408_v18  ;;  %v297_v38 = vadd.f32 %v895_v30, %v296_v19  ;;  %v484_v18 = vlaneseq }
 0x10e   :  { %v443_v35 = vmul.f32 %v339_v25, %v339_v25 }
 0x10f   :  { %v370_v49 = vmul.f32 %v337_v34, %v297_v38  ;;  %v406_v52 = vmul.f32 %v297_v38, %v297_v38 }
 0x110   :  { %382 = vmatpush.xpose.msrb.mxu1 %v373_v21  ;;  %454 = vmatpush.xpose.msrb.mxu3 %v445_v22  ;;  %v485_v22 = vand.u32 127, %v484_v18 }
 0x112   :  { %vm489_vm3 = vcmp.lt.s32.totalorder %v485_v22, 8 }
 0x114   :  { %383 = vmatpush.xpose.msrb.mxu1 %v372_v27  ;;  %455 = vmatpush.xpose.msrb.mxu3 %v444_v29  ;;  %v298_v32 = vpop.f32.mrf.mxu0 }
 0x115   :  { %v299_v33 = vadd.f32 %v895_v30, %v298_v32 }
 0x117   :  { %v371_v26 = vmul.f32 %v339_v25, %v299_v33  ;;  %v407_v40 = vmul.f32 %v299_v33, %v299_v33  ;;  %v490_v25 = vld [vmem:[%s992_s4] sm:$0x1] }
 0x118   :  { %456 = vmatpush.xpose.msrb.mxu3 %v443_v35  ;;  %v840_v35 = vmov 0.0  }
 0x119   :  { %384 = vmatpush.xpose.msrb.mxu1 %v371_v26  ;;  %420 = vmatpush.xpose.msrb.mxu2 %v407_v40  ;;  %361 = vst.msk [vmem:[#allocation2] sm:$0x1] %vm360_vm5, %v840_v35 }
 0x11c   :  { %457 = vmatpush.xpose.msrb.mxu3 %v442_v45 }
 0x11d   :  { %385 = vmatpush.xpose.msrb.mxu1 %v370_v49  ;;  %421 = vmatpush.xpose.msrb.mxu2 %v406_v52 }
 0x120   :  { %458 = vmatpush.xpose.msrb.mxu3 %v441_v54  ;;  %v493_v52 = vld [vmem:[#allocation2] sm:$0x1] }
 0x121   :  { %386 = vmatpush.xpose.msrb.mxu1 %v369_v56  ;;  %422 = vmatpush.xpose.msrb.mxu2 %v405_v57 }
 0x124   :  { %459 = vmatpush.xpose.msrb.mxu3 %v440_v59 }
 0x125   :  { %387 = vmatpush.xpose.msrb.mxu1 %v368_v62  ;;  %423 = vmatpush.xpose.msrb.mxu2 %v404_v63 }
 0x128   :  { %460 = vmatpush.xpose.msrb.mxu3 %v439_v0 }
 0x129   :  { %388 = vmatpush.xpose.msrb.mxu1 %v367_v2  ;;  %424 = vmatpush.xpose.msrb.mxu2 %v403_v3 }
 0x12c   :  { %461 = vmatpush.xpose.msrb.mxu3 %v438_v46 }
 0x12d   :  { %389 = vmatpush.xpose.msrb.mxu1 %v366_v51  ;;  %425 = vmatpush.xpose.msrb.mxu2 %v402_v4 }
 0x130   :  { %462 = vmatpush.xpose.msrb.mxu3 %v437_v5 }
 0x131   :  { %390 = vmatpush.xpose.msrb.mxu1 %v917_v44  ;;  %426 = vmatpush.xpose.msrb.mxu2 %v401_v39  ;;  %v317_v44 = vadd.f32 %v895_v30, %v316_v61 }
 0x133   :  { %v434_v28 = vmul.f32 %v317_v44, %v317_v44  ;;  %v362_v11 = vmul.f32 %v317_v44, %v277_v43 }
 0x134   :  { %463 = vmatpush.xpose.msrb.mxu3 %v436_v47 }
 0x135   :  { %391 = vmatpush.xpose.msrb.mxu1 %v905_v37  ;;  %427 = vmatpush.xpose.msrb.mxu2 %v400_v9 }
 0x138   :  { %464 = vmatpush.xpose.msrb.mxu3 %v435_v42 }
 0x139   :  { %392 = vmatpush.xpose.msrb.mxu1 %v363_v10  ;;  %428 = vmatpush.xpose.msrb.mxu2 %v399_v31 }
 0x13c   :  { %465 = vmatpush.xpose.msrb.mxu3 %v434_v28 }
 0x13d   :  { %393 = vmatpush.xpose.msrb.mxu1 %v362_v11  ;;  %429 = vmatpush.xpose.msrb.mxu2 %v398_v12 }
 0x13f   :  { %466 = vmatmul.f32.vlgmr.msrb.gmra.mxu3 %v838_v36 }
 0x140   :  { %430 = vmatmul.f32.vlgmr.msrb.gmra.mxu2 %v838_v36  ;;  %394 = vmatmul.f32.vlgmr.msrb.gmra.mxu1 %v838_v36 }
 0x1bd   :  { %v395_v20 = vpop.f32.mrf.mxu1 }
 0x1c2   :  { %v467_v37 = vpop.f32.mrf.mxu3 }
 0x1c3   :  { %v431_v13 = vpop.f32.mrf.mxu2 }
 0x1c4   :  { %v470_v24 = vmul.f32 %v467_v37, %v431_v13 }
 0x1c6   :  { %v471_v14 = vmax.f32 %v470_v24, 1e-08 }
 0x1c8   :  { %703 = vrsqrt.f32 %v471_v14  ;;  %vm478_vm1 = vweird.f32 %v471_v14 }
 0x1ce   :  { %v704_v30 = vpop.eup %703 }
 0x1cf   :  { %v473_v15 = vmul.f32 %v704_v30, %v471_v14  ;;  %vm479_vm0 = vweird.f32 %v704_v30 }
 0x1d0   :  { %vm480_vm2 = vmor %vm478_vm1, %vm479_vm0 }
 0x1d1   :  { %v474_v16 = vmul.f32 %v704_v30, %v473_v15 }
 0x1d3   :  { %v475_v17 = vmul.f32 0.5, %v474_v16 }
 0x1d5   :  { %v476_v19 = vsub.f32 1.5, %v475_v17 }
 0x1d7   :  { %v477_v21 = vmul.f32 %v704_v30, %v476_v19 }
 0x1d9   :  { %v481_v23 = vsel %vm480_vm2, %v704_v30, %v477_v21 }
 0x1da   :  { %v482_v27 = vmul.f32 %v481_v23, %v395_v20 }
 0x1dc   :  { %483 = vst [vmem:[#allocation10] sm:$0x1] %v482_v27  ;;  %v491_v29 = vsub.f32 %v482_v27, %v490_v25 }
 0x1dd   :  { %534 = dma.vmem_to_hbm [thread:$0]  %s530_s15, 16, %s532_s18, [#allocation11]  }
 0x1de   :  { %v492_v32 = vsel %vm489_vm3, %v491_v29, 0.0 }
 0x1df   :  { %v494_v33 = vmul.f32 %v492_v32, %v492_v32 }
 0x1e1   :  { %v496_v34 = vsel %vm495_vm4, %v494_v33, 0.0 }
 0x1e2   :  { %497 = vadd.xlane.f32.xlu0 %v496_v34 }
 0x255   :  { %v498_v38 = vpop.xlane.xlu0 %497 }
 0x256   :  { %v499_v26 = vrot.slane %v498_v38, 4 }
 0x258   :  { %v500_v40 = vadd.f32 %v499_v26, %v498_v38 }
 0x25a   :  { %v501_v41 = vrot.slane %v500_v40, 2 }
 0x25c   :  { %v502_v45 = vadd.f32 %v501_v41, %v500_v40 }
 0x25e   :  { %v503_v48 = vrot.slane %v502_v45, 1 }
 0x260   :  { %v504_v49 = vadd.f32 %v503_v48, %v502_v45 }
 0x262   :  { %691 = vpush %v504_v49 }
 0x293   :  { %s692_s4 = spop %691 }
 0x294   :  { %v506_v53 = vstv %s692_s4 }
 0x295   :  { %v507_v54 = vadd.f32 %v506_v53, %v493_v52 }
 0x297   :  { %509 = vst.msk [vmem:[#allocation2] sm:$0x1] %vm360_vm5, %v507_v54 }
 0x29e   :  { %v510_v55 = vld [vmem:[#allocation2] sm:$0x1] }
 0x29f   :  { %v511_v56 = vmul.f32 0.125, %v510_v55 }
 0x2a1   :  { %512 = vst.msk [vmem:[#allocation9] sm:$0x1] %vm360_vm5, %v511_v56 }
 0x2a2   :  { %523 = dma.vmem_to_hbm [thread:$0]  %s519_s19, 16, %s521_s22, [#allocation5]  }
 0x2a3   :  { %829 = dma.done.wait [#allocation5], 16  }
 0x2a4   :  { %830 = vsyncadd [#allocation5], 4294967280 }
 0x2a5   :  { %831 = dma.done.wait [#allocation11], 16  }
 0x2a6   :  { %832 = vsyncadd [#allocation11], 4294967280 }
 0x2a7   :  { %543 = vsyncpa [#allocation4], 1 }
 0x2a8   :  { %544 = vsyncpa [#allocation7], 1 }
 0x2a9   :  { %545 = vsyncpa [#allocation5], 1 }
 0x2aa   :  { %546 = vsyncpa [#allocation11], 1 }

</bundles_post_ra>
